<compile_context>
chip_gen: v7x
topology: tpu7x:2x2x1
jax: 0.10.0
libtpu: 0.0.40
codegen_flags: <defaults>
</compile_context>

<pallas_src>
import jax
import jax.numpy as jnp
from jax.experimental import pallas as pl
from jax.experimental.pallas import tpu as pltpu

OUT_LANES = 128                       # lane-dense output width (q1=lane 0, q2=lane 1)
_SINGLE_BUFFER_BYTES = 4 << 20        # single-buffer resident weights above this


def _round_up(x, m):
    return ((x + m - 1) // m) * m


def _pick_batch_tile(B):
    """Batch tile: whole (8-padded) batch when tiny, else >= 2 grid steps.

    >= 2 "parallel" grid steps let v7x's two TensorCores each take half the
    batch; the 256-row cap matches the 256-wide MXU on v6e/v7x and bounds the
    (block_b, Hf) f32 activation temporaries.
    """
    if B < 16:
        return _round_up(max(B, 1), 8)
    return min(256, _round_up((B + 1) // 2, 8))


def pack_double_q_params(params_q1, params_q2, obs_dim, act_dim,
                         param_dtype=jnp.bfloat16):
    """Pack both Q-heads into padded, fused parameter arrays (call ONCE per
    parameter update, not per forward call).

    Returns a dict with:
      w1   (in_p, Hf)                 heads side by side along lanes
      w2   (2H, H)  if H % 128 == 0   [W2a; W2b] stacked (split path)
           (Hf, Hf) otherwise          block-diag(W2a, W2b)
      w3   (Hf, 128)                  W3a -> col 0, W3b -> col 1
      bias (8, Hf) float32            rows 0/1 = fused b1/b2, row 2 cols 0/1 = b3
      meta dict of static layout info
    """
    w1a, b1a, w2a, b2a, w3a, b3a = params_q1
    w1b, b1b, w2b, b2b, w3b, b3b = params_q2
    K = obs_dim + act_dim
    H = w1a.shape[1]
    in_p = _round_up(K, 8)
    Hf = max(_round_up(2 * H, 128), 128)
    split_w2 = (H >= 128) and (H % 128 == 0)      # lane-aligned halves
    f = jnp.float32

    w1 = jnp.zeros((in_p, Hf), f)
    w1 = w1.at[:K, :H].set(w1a.astype(f))
    w1 = w1.at[:K, H:2 * H].set(w1b.astype(f))

    if split_w2:
        # Hf == 2H here: two H-wide matrices stacked, no stored zero blocks.
        w2 = jnp.concatenate([w2a.astype(f), w2b.astype(f)], axis=0)
    else:
        w2 = jnp.zeros((Hf, Hf), f)
        w2 = w2.at[:H, :H].set(w2a.astype(f))
        w2 = w2.at[H:2 * H, H:2 * H].set(w2b.astype(f))

    w3 = jnp.zeros((Hf, OUT_LANES), f)
    w3 = w3.at[:H, 0:1].set(w3a.astype(f))
    w3 = w3.at[H:2 * H, 1:2].set(w3b.astype(f))

    bias = jnp.zeros((8, Hf), f)
    bias = bias.at[0, :H].set(b1a.reshape(-1).astype(f))
    bias = bias.at[0, H:2 * H].set(b1b.reshape(-1).astype(f))
    bias = bias.at[1, :H].set(b2a.reshape(-1).astype(f))
    bias = bias.at[1, H:2 * H].set(b2b.reshape(-1).astype(f))
    bias = bias.at[2, 0:1].set(b3a.reshape(-1).astype(f))
    bias = bias.at[2, 1:2].set(b3b.reshape(-1).astype(f))

    return dict(
        w1=w1.astype(param_dtype),
        w2=w2.astype(param_dtype),
        w3=w3.astype(param_dtype),
        bias=bias,                                 # biases stay f32
        meta=dict(obs_dim=obs_dim, act_dim=act_dim, H=H, Hf=Hf,
                  in_p=in_p, split_w2=split_w2),
    )


def _make_kernel(H, split_w2):
    def kernel(x_ref, w1_ref, w2_ref, w3_ref, b_ref, q_ref):
        f32 = jnp.float32
        b1 = b_ref[0:1, :]                         # (1, Hf) f32
        b2 = b_ref[1:2, :]
        b3 = b_ref[2:3, 0:OUT_LANES]

        # Layer 1: single merged matmul over the padded cat(obs, act) input.
        h = jnp.dot(x_ref[...], w1_ref[...], preferred_element_type=f32) + b1
        h = jnp.maximum(h, 0.0)

        # Layer 2: two H-wide matmuls on lane-aligned halves when H % 128 == 0,
        # otherwise the block-diagonal fused form (tiny-H / demo case).
        hc = h.astype(w2_ref.dtype)
        if split_w2:
            h1 = jnp.dot(hc[:, :H], w2_ref[:H, :], preferred_element_type=f32)
            h2 = jnp.dot(hc[:, H:2 * H], w2_ref[H:2 * H, :],
                         preferred_element_type=f32)
            h = jnp.concatenate([h1, h2], axis=-1) + b2
        else:
            h = jnp.dot(hc, w2_ref[...], preferred_element_type=f32) + b2
        h = jnp.maximum(h, 0.0)

        # Layer 3: narrow 128-lane output; Q1 -> lane 0, Q2 -> lane 1.
        q = jnp.dot(h.astype(w3_ref.dtype), w3_ref[...],
                    preferred_element_type=f32) + b3
        q_ref[...] = q.astype(q_ref.dtype)

    return kernel


def double_q_critic_forward(obs, action, packed):
    """Fused double-Q forward from pre-packed params. Returns (q1, q2), (B,1) f32."""
    assert obs.shape[0] == action.shape[0]
    meta = packed["meta"]
    obs_dim, act_dim = meta["obs_dim"], meta["act_dim"]
    H, Hf, in_p, split_w2 = meta["H"], meta["Hf"], meta["in_p"], meta["split_w2"]
    assert obs.shape[1] == obs_dim and action.shape[1] == act_dim
    B = obs.shape[0]
    K = obs_dim + act_dim

    w1, w2, w3, bias = packed["w1"], packed["w2"], packed["w3"], packed["bias"]
    cdt = w1.dtype

    # Wrapper-side concat + pad (cheap XLA glue) -> one lane/sublane-friendly input.
    x = jnp.concatenate([obs.astype(cdt), action.astype(cdt)], axis=-1)
    block_b = _pick_batch_tile(B)
    Bp = _round_up(B, block_b)
    x = jnp.pad(x, ((0, Bp - B), (0, in_p - K)))
    grid = (Bp // block_b,)

    # VMEM budget: resident weights (+bias) plus double-buffered IO and f32 temporaries.
    weight_bytes = sum(int(a.size) * a.dtype.itemsize for a in (w1, w2, w3, bias))
    io_bytes = 2 * (block_b * in_p * cdt.itemsize + block_b * OUT_LANES * 4)
    act_bytes = 4 * block_b * Hf * 4
    single_buffer = weight_bytes > _SINGLE_BUFFER_BYTES
    needed = (1 if single_buffer else 2) * weight_bytes + io_bytes + act_bytes
    vmem_limit = int(min(max(needed * 3 // 2 + (4 << 20), 32 << 20), 96 << 20))

    def w_spec(shape):
        # Constant index_map -> weights stay resident across all batch steps.
        if single_buffer:
            return pl.BlockSpec(shape, lambda i: (0, 0),
                                pipeline_mode=pl.Buffered(1))
        return pl.BlockSpec(shape, lambda i: (0, 0))

    out = pl.pallas_call(
        _make_kernel(H, split_w2),
        out_shape=jax.ShapeDtypeStruct((Bp, OUT_LANES), jnp.float32),
        grid_spec=pltpu.PrefetchScalarGridSpec(
            num_scalar_prefetch=0,
            grid=grid,
            in_specs=[
                pl.BlockSpec((block_b, in_p), lambda i: (i, 0)),
                w_spec(w1.shape),
                w_spec(w2.shape),
                w_spec(w3.shape),
                w_spec(bias.shape),
            ],
            out_specs=pl.BlockSpec((block_b, OUT_LANES), lambda i: (i, 0)),
        ),
        compiler_params=pltpu.CompilerParams(
            dimension_semantics=("parallel",),
            vmem_limit_bytes=vmem_limit,
        ),
    )(x, w1, w2, w3, bias)

    return out[:B, 0:1], out[:B, 1:2]


def double_q_critic(obs, action, params_q1, params_q2,
                    param_dtype=jnp.bfloat16):
    """Convenience wrapper. In a training loop, hoist pack_double_q_params out
    of the per-step path and call double_q_critic_forward directly."""
    packed = pack_double_q_params(params_q1, params_q2,
                                  obs.shape[1], action.shape[1], param_dtype)
    return double_q_critic_forward(obs, action, packed)


def init_mlp_params(key, in_dim, hidden_dim, out_dim=1):
    """Deterministic synthetic init (stand-in for utils.weight_init)."""
    k1, k2, k3, k4, k5, k6 = jax.random.split(key, 6)
    s_in = 1.0 / jnp.sqrt(in_dim)
    s_h = 1.0 / jnp.sqrt(hidden_dim)
    w1 = jax.random.normal(k1, (in_dim, hidden_dim), jnp.float32) * s_in
    b1 = 0.1 * jax.random.normal(k4, (1, hidden_dim), jnp.float32)
    w2 = jax.random.normal(k2, (hidden_dim, hidden_dim), jnp.float32) * s_h
    b2 = 0.1 * jax.random.normal(k5, (1, hidden_dim), jnp.float32)
    w3 = jax.random.normal(k3, (hidden_dim, out_dim), jnp.float32) * s_h
    b3 = 0.1 * jax.random.normal(k6, (1, out_dim), jnp.float32)
    return (w1, b1, w2, b2, w3, b3)


def reference_forward(obs, action, params_q1, params_q2):
    """Pure-JAX reference (mirrors the PyTorch module semantics)."""
    x = jnp.concatenate([obs, action], axis=-1)

    def mlp(p):
        w1, b1, w2, b2, w3, b3 = p
        h = jnp.maximum(x @ w1 + b1, 0.0)
        h = jnp.maximum(h @ w2 + b2, 0.0)
        return h @ w3 + b3

    return mlp(params_q1), mlp(params_q2)


if __name__ == "__main__":
    key = jax.random.PRNGKey(0)
    k_obs, k_act, k_q1, k_q2, k2_obs, k2_act, k2_q1, k2_q2 = jax.random.split(key, 8)

    # --- Case 1: tiny SAC-critic shapes, f32 params (block-diag W2 path, H < 128).
    B, OBS_DIM, ACT_DIM, HIDDEN = 8, 16, 8, 32
    obs = jax.random.normal(k_obs, (B, OBS_DIM), jnp.float32)
    action = jax.random.normal(k_act, (B, ACT_DIM), jnp.float32)
    p1 = init_mlp_params(k_q1, OBS_DIM + ACT_DIM, HIDDEN)
    p2 = init_mlp_params(k_q2, OBS_DIM + ACT_DIM, HIDDEN)

    packed_f32 = pack_double_q_params(p1, p2, OBS_DIM, ACT_DIM,
                                      param_dtype=jnp.float32)  # packed once, off hot path
    q1, q2 = double_q_critic_forward(obs, action, packed_f32)
    jax.block_until_ready((q1, q2))

    r1, r2 = reference_forward(obs, action, p1, p2)
    assert q1.shape == (B, 1) and q2.shape == (B, 1)
    assert jnp.allclose(q1, r1, atol=1e-4, rtol=1e-4)
    assert jnp.allclose(q2, r2, atol=1e-4, rtol=1e-4)

    # --- Case 2: split-W2 path (H = 128), bf16 weights, non-multiple dims and a
    #     batch that forces padding + a 2-step "parallel" grid.
    B2, OBS2, ACT2, H2 = 24, 11, 3, 128
    obs2 = jax.random.normal(k2_obs, (B2, OBS2), jnp.float32)
    act2 = jax.random.normal(k2_act, (B2, ACT2), jnp.float32)
    p1b = init_mlp_params(k2_q1, OBS2 + ACT2, H2)
    p2b = init_mlp_params(k2_q2, OBS2 + ACT2, H2)

    packed_bf16 = pack_double_q_params(p1b, p2b, OBS2, ACT2,
                                       param_dtype=jnp.bfloat16)
    q1b, q2b = double_q_critic_forward(obs2, act2, packed_bf16)
    jax.block_until_ready((q1b, q2b))

    r1b, r2b = reference_forward(obs2, act2, p1b, p2b)
    assert q1b.shape == (B2, 1) and q2b.shape == (B2, 1)
    assert jnp.allclose(q1b, r1b, atol=5e-2, rtol=5e-2)
    assert jnp.allclose(q2b, r2b, atol=5e-2, rtol=5e-2)

    print("KERNEL_OK")
</pallas_src>

<mosaic_0001>
module attributes {stable_mosaic.version = 11 : i64} {
  func.func @kernel(%arg0: i32, %arg1: memref<8x24xf32, #tpu.memory_space<vmem>>, %arg2: memref<24x128xf32, #tpu.memory_space<vmem>>, %arg3: memref<128x128xf32, #tpu.memory_space<vmem>>, %arg4: memref<128x128xf32, #tpu.memory_space<vmem>>, %arg5: memref<8x128xf32, #tpu.memory_space<vmem>>, %arg6: memref<8x128xf32, #tpu.memory_space<vmem>>) attributes {dimension_semantics = [#tpu.dimension_semantics<parallel>], iteration_bounds = array<i64: 1>, scalar_prefetch = 0 : i64, scratch_operands = 0 : i64, tpu.core_type = #tpu.core_type<tc>, window_params = [{transform_indices = @transform_0, window_bounds = array<i64: 8, 24>}, {pipeline_mode = #tpu.pipeline_mode<synchronous>, transform_indices = @transform_1, window_bounds = array<i64: 24, 128>}, {pipeline_mode = #tpu.pipeline_mode<synchronous>, transform_indices = @transform_2, window_bounds = array<i64: 128, 128>}, {pipeline_mode = #tpu.pipeline_mode<synchronous>, transform_indices = @transform_3, window_bounds = array<i64: 128, 128>}, {pipeline_mode = #tpu.pipeline_mode<synchronous>, transform_indices = @transform_4, window_bounds = array<i64: 8, 128>}, {transform_indices = @transform_5, window_bounds = array<i64: 8, 128>}]} {
    %c0 = arith.constant 0 : index
    %c0_0 = arith.constant 0 : index
    %0 = vector.load %arg5[%c0, %c0_0] : memref<8x128xf32, #tpu.memory_space<vmem>>, vector<1x128xf32>
    %c1 = arith.constant 1 : index
    %c0_1 = arith.constant 0 : index
    %1 = vector.load %arg5[%c1, %c0_1] : memref<8x128xf32, #tpu.memory_space<vmem>>, vector<1x128xf32>
    %c2 = arith.constant 2 : index
    %c0_2 = arith.constant 0 : index
    %2 = vector.load %arg5[%c2, %c0_2] : memref<8x128xf32, #tpu.memory_space<vmem>>, vector<1x128xf32>
    %c0_3 = arith.constant 0 : index
    %c0_4 = arith.constant 0 : index
    %3 = vector.load %arg1[%c0_3, %c0_4] : memref<8x24xf32, #tpu.memory_space<vmem>>, vector<8x24xf32>
    %c0_5 = arith.constant 0 : index
    %c0_6 = arith.constant 0 : index
    %4 = vector.load %arg2[%c0_5, %c0_6] : memref<24x128xf32, #tpu.memory_space<vmem>>, vector<24x128xf32>
    %cst = arith.constant dense<0.000000e+00> : vector<8x128xf32>
    %5 = tpu.matmul %3, %4, %cst {dimension_numbers = #tpu.dot_dimension_numbers<[1], [0], [0], [1], [0, 0, 1, 1], [], []>} : vector<8x24xf32>, vector<24x128xf32>, vector<8x128xf32> -> vector<8x128xf32>
    %6 = vector.broadcast %0 : vector<1x128xf32> to vector<8x128xf32>
    %7 = arith.addf %5, %6 : vector<8x128xf32>
    %cst_7 = arith.constant 0.000000e+00 : f32
    %8 = vector.broadcast %cst_7 : f32 to vector<8x128xf32>
    %9 = arith.maximumf %7, %8 : vector<8x128xf32>
    %c0_8 = arith.constant 0 : index
    %c0_9 = arith.constant 0 : index
    %10 = vector.load %arg3[%c0_8, %c0_9] : memref<128x128xf32, #tpu.memory_space<vmem>>, vector<128x128xf32>
    %cst_10 = arith.constant dense<0.000000e+00> : vector<8x128xf32>
    %11 = tpu.matmul %9, %10, %cst_10 {dimension_numbers = #tpu.dot_dimension_numbers<[1], [0], [0], [1], [0, 0, 1, 1], [], []>} : vector<8x128xf32>, vector<128x128xf32>, vector<8x128xf32> -> vector<8x128xf32>
    %12 = vector.broadcast %1 : vector<1x128xf32> to vector<8x128xf32>
    %13 = arith.addf %11, %12 : vector<8x128xf32>
    %cst_11 = arith.constant 0.000000e+00 : f32
    %14 = vector.broadcast %cst_11 : f32 to vector<8x128xf32>
    %15 = arith.maximumf %13, %14 : vector<8x128xf32>
    %c0_12 = arith.constant 0 : index
    %c0_13 = arith.constant 0 : index
    %16 = vector.load %arg4[%c0_12, %c0_13] : memref<128x128xf32, #tpu.memory_space<vmem>>, vector<128x128xf32>
    %cst_14 = arith.constant dense<0.000000e+00> : vector<8x128xf32>
    %17 = tpu.matmul %15, %16, %cst_14 {dimension_numbers = #tpu.dot_dimension_numbers<[1], [0], [0], [1], [0, 0, 1, 1], [], []>} : vector<8x128xf32>, vector<128x128xf32>, vector<8x128xf32> -> vector<8x128xf32>
    %18 = vector.broadcast %2 : vector<1x128xf32> to vector<8x128xf32>
    %19 = arith.addf %17, %18 : vector<8x128xf32>
    %c0_15 = arith.constant 0 : index
    %c0_16 = arith.constant 0 : index
    %20 = vector.load %arg6[%c0_15, %c0_16] : memref<8x128xf32, #tpu.memory_space<vmem>>, vector<8x128xf32>
    tpu.vector_store %arg6[%c0_15, %c0_16], %19 {strides = array<i32>} : memref<8x128xf32, #tpu.memory_space<vmem>>, vector<8x128xf32>,
    return
  }
  func.func @transform_0(%arg0: i32) -> (i32, i32) {
    %c0_i32 = arith.constant 0 : i32
    %c0_i32_0 = arith.constant 0 : i32
    return %arg0, %c0_i32 : i32, i32
  }
  func.func @transform_1(%arg0: i32) -> (i32, i32) {
    %c0_i32 = arith.constant 0 : i32
    %c0_i32_0 = arith.constant 0 : i32
    %c0_i32_1 = arith.constant 0 : i32
    return %c0_i32, %c0_i32_0 : i32, i32
  }
  func.func @transform_2(%arg0: i32) -> (i32, i32) {
    %c0_i32 = arith.constant 0 : i32
    %c0_i32_0 = arith.constant 0 : i32
    %c0_i32_1 = arith.constant 0 : i32
    return %c0_i32, %c0_i32_0 : i32, i32
  }
  func.func @transform_3(%arg0: i32) -> (i32, i32) {
    %c0_i32 = arith.constant 0 : i32
    %c0_i32_0 = arith.constant 0 : i32
    %c0_i32_1 = arith.constant 0 : i32
    return %c0_i32, %c0_i32_0 : i32, i32
  }
  func.func @transform_4(%arg0: i32) -> (i32, i32) {
    %c0_i32 = arith.constant 0 : i32
    %c0_i32_0 = arith.constant 0 : i32
    %c0_i32_1 = arith.constant 0 : i32
    return %c0_i32, %c0_i32_0 : i32, i32
  }
  func.func @transform_5(%arg0: i32) -> (i32, i32) {
    %c0_i32 = arith.constant 0 : i32
    %c0_i32_0 = arith.constant 0 : i32
    return %arg0, %c0_i32 : i32, i32
  }
}

</mosaic_0001>

<bundles_post_ra>
// kernel: tpu_custom_call.1
= control target key start
LH: loop header
LB: loop body
LE: loop exit
PB: predicated region body
PF: predicated region fallthrough
CT: control target
= control target key end

     0   :  { %10 = vsyncpa [#allocation3], 0  ;;  %s797_s0 = inlined_call_operand.hbm [shape: f32[8,24], index: 0, kind: input, shape index: {}]   ;;  %s798_s1 = inlined_call_operand.hbm [shape: f32[24,128], index: 1, kind: input, shape index: {}]   ;;  %s799_s2 = inlined_call_operand.hbm [shape: f32[128,128], index: 2, kind: input, shape index: {}]   ;;  %s800_s3 = inlined_call_operand.hbm [shape: f32[128,128], index: 3, kind: input, shape index: {}]   ;;  %s801_s4 = inlined_call_operand.vmem [shape: f32[8,128], index: 4, kind: input, shape index: {}]   ;;  %s802_s5 = inlined_call_operand.hbm [shape: f32[8,128], index: 5, kind: output, shape index: {}]  }
   0x1   :  { %11 = vsyncpa [#allocation6], 0 }
   0x2   :  { %12 = vsyncpa [#allocation9], 0 }
   0x3   :  { %13 = vsyncpa [#allocation4], 0  ;;  %s659_s18 = smov [#allocation5]   ;;  %s541_s22 = scalar_lea.hbm %s798_s1, 384 }
   0x4   :  { %s29_s19 = sshll.u32 %s659_s18, 4  ;;  %p542_p0 = scmp.ne.s32.totalorder %s798_s1, %s541_s22  ;;  %s30_s19 = int_to_ptr.vmem [resolvable:$true] %s29_s19 }
   0x5   :  { %p545_p1 = scmp.lt.u32.totalorder %s541_s22, %s798_s1 }
   0x7   :  { %p547_p2 = pnand %p545_p1, %p542_p0 }
   0x9   :  { %550 = shalt.err (!%p547_p2)
}
   0xa   :  { %s551_s27 = scalar_lea.vmem %s30_s19, 384  ;;  %p556_p4 = scmp.lt.s32.totalorder %s30_s19, %s30_s19 }
   0xb   :  { %p552_p3 = scmp.ne.s32.totalorder %s30_s19, %s551_s27  ;;  %p557_p5 = scmp.lt.s32.totalorder %s551_s27, %s551_s27 }
   0xd   :  { %p558_p6 = por %p557_p5, %p556_p4 }
   0xf   :  { %p559_p7 = pnand %p558_p6, %p552_p3 }
  0x11   :  { %562 = shalt.err (!%p559_p7)
}
  0x12   :  { %s660_s28 = smov 128   ;;  %s661_s29 = smov 8  }
  0x13   :  { %35 = dma.hbm_to_vmem [thread:$0]  %s798_s1, 384, %s30_s19, [#allocation6], %s660_s28, %s660_s28, %s661_s29  }
  0x14   :  { %s662_s7 = smov [#allocation2]   ;;  %s663_s9 = smov [#allocation7]  }
  0x15   :  { %s20_s8 = sshll.u32 %s662_s7, 4  ;;  %s41_s10 = sshll.u32 %s663_s9, 4  ;;  %s21_s8 = int_to_ptr.vmem [resolvable:$true] %s20_s8  ;;  %s42_s10 = int_to_ptr.vmem [resolvable:$true] %s41_s10 }
  0x16   :  { %s563_s13 = scalar_lea.hbm %s797_s0, 128 }
  0x17   :  { %p564_p8 = scmp.ne.s32.totalorder %s797_s0, %s563_s13  ;;  %p567_p9 = scmp.lt.u32.totalorder %s563_s13, %s797_s0 }
  0x19   :  { %p569_p10 = pnand %p567_p9, %p564_p8 }
  0x1b   :  { %572 = shalt.err (!%p569_p10)
}
  0x1c   :  { %s573_s1 = scalar_lea.vmem %s21_s8, 128  ;;  %p578_p12 = scmp.lt.s32.totalorder %s21_s8, %s21_s8 }
  0x1d   :  { %p574_p11 = scmp.ne.s32.totalorder %s21_s8, %s573_s1  ;;  %p579_p13 = scmp.lt.s32.totalorder %s573_s1, %s573_s1 }
  0x1f   :  { %p580_p0 = por %p579_p13, %p578_p12 }
  0x21   :  { %p581_p1 = pnand %p580_p0, %p574_p11 }
  0x23   :  { %584 = shalt.err (!%p581_p1)
}
  0x24   :  { %23 = dma.hbm_to_vmem [thread:$0]  %s797_s0, 128, %s21_s8, [#allocation3]  }
  0x25   :  { %s585_s22 = scalar_lea.hbm %s799_s2, 2048 }
  0x26   :  { %p586_p2 = scmp.ne.s32.totalorder %s799_s2, %s585_s22  ;;  %p589_p3 = scmp.lt.u32.totalorder %s585_s22, %s799_s2 }
  0x28   :  { %p591_p4 = pnand %p589_p3, %p586_p2 }
  0x2a   :  { %594 = shalt.err (!%p591_p4)
}
  0x2b   :  { %s595_s27 = scalar_lea.vmem %s42_s10, 2048  ;;  %p600_p6 = scmp.lt.s32.totalorder %s42_s10, %s42_s10 }
  0x2c   :  { %p596_p5 = scmp.ne.s32.totalorder %s42_s10, %s595_s27  ;;  %p601_p7 = scmp.lt.s32.totalorder %s595_s27, %s595_s27 }
  0x2e   :  { %p602_p8 = por %p601_p7, %p600_p6 }
  0x30   :  { %p603_p9 = pnand %p602_p8, %p596_p5 }
  0x32   :  { %606 = shalt.err (!%p603_p9)
}
  0x33   :  { %47 = dma.hbm_to_vmem [thread:$0]  %s799_s2, 2048, %s42_s10, [#allocation6], %s660_s28, %s660_s28, %s661_s29  }
  0x34   :  { %s664_s6 = smov [#allocation8]   ;;  %s607_s11 = scalar_lea.hbm %s800_s3, 2048 }
  0x35   :  { %s53_s7 = sshll.u32 %s664_s6, 4  ;;  %p608_p10 = scmp.ne.s32.totalorder %s800_s3, %s607_s11  ;;  %s54_s7 = int_to_ptr.vmem [resolvable:$true] %s53_s7 }
  0x36   :  { %p611_p11 = scmp.lt.u32.totalorder %s607_s11, %s800_s3 }
  0x38   :  { %p613_p12 = pnand %p611_p11, %p608_p10 }
  0x3a   :  { %616 = shalt.err (!%p613_p12)
}
  0x3b   :  { %s617_s16 = scalar_lea.vmem %s54_s7, 2048  ;;  %p622_p0 = scmp.lt.s32.totalorder %s54_s7, %s54_s7 }
  0x3c   :  { %p618_p13 = scmp.ne.s32.totalorder %s54_s7, %s617_s16  ;;  %p623_p1 = scmp.lt.s32.totalorder %s617_s16, %s617_s16 }
  0x3e   :  { %p624_p2 = por %p623_p1, %p622_p0 }
  0x40   :  { %p625_p3 = pnand %p624_p2, %p618_p13 }
  0x42   :  { %628 = shalt.err (!%p625_p3)
}
  0x43   :  { %59 = dma.hbm_to_vmem [thread:$0]  %s800_s3, 2048, %s54_s7, [#allocation9], %s660_s28, %s660_s28, %s661_s29  }
  0x44   :  { %651 = dma.done.wait [#allocation3], 128  }
  0x45   :  { %652 = vsyncadd [#allocation3], 4294967168 }
  0x46   :  { %653 = dma.done.wait [#allocation6], 2432  }
  0x47   :  { %654 = vsyncadd [#allocation6], 4294964864 }
  0x48   :  { %655 = dma.done.wait [#allocation9], 2048  }
  0x49   :  { %656 = vsyncadd [#allocation9], 4294965248  ;;  %v665_v0 = vmov 0.0|0.0   ;;  %vm666_vm0 = vmmov 0   ;;  %v667_v1 = vmov 0.0   ;;  %v78_v2 = vld [vmem:[#allocation5] sm:$0xff] }
  0x4a   :  { %480 = vmatprep.subr.bf16.mxu0 %v665_v0  ;;  %407 = vmatprep.mubr.msk.f32.mxu0 %vm666_vm0, %v667_v1  ;;  %v79_v3 = vld [vmem:[#allocation5 + $0x8] sm:$0xff]  ;;  %v160_v5 = vld [vmem:[#allocation7] sm:$0xff]  ;;  %v161_v6 = vld [vmem:[#allocation7 + $0x8] sm:$0xff]  ;;  %vm85_vm1 = vcmask 195584   ;;  %s668_s19 = smov [#allocation10]  }
  0x4b   :  { %483 = vmatprep.subr.bf16.mxu1 %v665_v0  ;;  %442 = vmatprep.mubr.msk.f32.mxu1 %vm666_vm0, %v667_v1  ;;  %v481_v4 = vpack.c.bf16 %v79_v3, %v78_v2  ;;  %v484_v7 = vpack.c.bf16 %v161_v6, %v160_v5  ;;  %v162_v8 = vld [vmem:[#allocation7 + $0x10] sm:$0xff]  ;;  %v163_v9 = vld [vmem:[#allocation7 + $0x18] sm:$0xff]  ;;  %v77_v12 = vld [vmem:[#allocation2] sm:$0xff]  ;;  %s348_s20 = sshll.u32 %s668_s19, 4  ;;  %s349_s20 = int_to_ptr.vmem [resolvable:$true] %s348_s20 }
  0x4c   :  { %v80_v10 = vld [vmem:[#allocation5 + $0x10] sm:$0xff]  ;;  %v487_v11 = vpack.c.bf16 %v163_v9, %v162_v8  ;;  %v164_v13 = vld [vmem:[#allocation7 + $0x20] sm:$0xff]  ;;  %v165_v14 = vld [vmem:[#allocation7 + $0x28] sm:$0xff]  ;;  %s629_s21 = scalar_lea.vmem %s349_s20, 128  ;;  %p634_p5 = scmp.lt.s32.totalorder %s349_s20, %s349_s20 }
  0x4d   :  { %482 = vmatpush3.bf16.msra.mxu0 %v481_v4  ;;  %485 = vmatpush3.bf16.msra.mxu1 %v484_v7  ;;  %v490_v15 = vpack.c.bf16 %v165_v14, %v164_v13  ;;  %v166_v16 = vld [vmem:[#allocation7 + $0x30] sm:$0xff]  ;;  %v167_v17 = vld [vmem:[#allocation7 + $0x38] sm:$0xff]  ;;  %v168_v19 = vld [vmem:[#allocation7 + $0x40] sm:$0xff]  ;;  %p630_p4 = scmp.ne.s32.totalorder %s349_s20, %s629_s21  ;;  %p635_p6 = scmp.lt.s32.totalorder %s629_s21, %s629_s21 }
  0x4e   :  { %405 = vmatprep.subr.mxu0 %v667_v1  ;;  %486 = vmatprep.subr.bf16.mxu1 %v665_v0  ;;  %v493_v18 = vpack.c.bf16 %v167_v17, %v166_v16  ;;  %v169_v20 = vld [vmem:[#allocation7 + $0x48] sm:$0xff]  ;;  %v170_v22 = vld [vmem:[#allocation7 + $0x50] sm:$0xff]  ;;  %v171_v23 = vld [vmem:[#allocation7 + $0x58] sm:$0xff] }
  0x4f   :  { %v496_v21 = vpack.c.bf16 %v169_v20, %v168_v19  ;;  %v499_v24 = vpack.c.bf16 %v171_v23, %v170_v22  ;;  %v172_v25 = vld [vmem:[#allocation7 + $0x60] sm:$0xff]  ;;  %v173_v26 = vld [vmem:[#allocation7 + $0x68] sm:$0xff]  ;;  %v174_v28 = vld [vmem:[#allocation7 + $0x70] sm:$0xff]  ;;  %p636_p7 = por %p635_p6, %p634_p5 }
  0x50   :  { %v502_v27 = vpack.c.bf16 %v173_v26, %v172_v25  ;;  %v175_v29 = vld [vmem:[#allocation7 + $0x78] sm:$0xff]  ;;  %v251_v31 = vld [vmem:[#allocation8] sm:$0xff]  ;;  %v252_v32 = vld [vmem:[#allocation8 + $0x8] sm:$0xff] }
  0x51   :  { %406 = vmatpush3.msra.mxu0 %v80_v10  ;;  %488 = vmatpush3.bf16.msra.mxu1 %v487_v11  ;;  %v505_v30 = vpack.c.bf16 %v175_v29, %v174_v28  ;;  %v253_v33 = vld [vmem:[#allocation8 + $0x10] sm:$0xff]  ;;  %v508_v34 = vpack.c.bf16 %v252_v32, %v251_v31  ;;  %v254_v35 = vld [vmem:[#allocation8 + $0x18] sm:$0xff]  ;;  %v255_v37 = vld [vmem:[#allocation8 + $0x20] sm:$0xff]  ;;  %p637_p8 = pnand %p636_p7, %p630_p4 }
  0x52   :  { %408 = vmatmul.mubr.msk.f32.vlgmr.msra.gmra.mrb[0].mxu0 %vm85_vm1, %v77_v12  ;;  %489 = vmatprep.subr.bf16.mxu1 %v665_v0  ;;  %v511_v36 = vpack.c.bf16 %v254_v35, %v253_v33  ;;  %v256_v38 = vld [vmem:[#allocation8 + $0x28] sm:$0xff]  ;;  %v257_v40 = vld [vmem:[#allocation8 + $0x30] sm:$0xff]  ;;  %v258_v41 = vld [vmem:[#allocation8 + $0x38] sm:$0xff] }
  0x53   :  { %507 = vmatprep.subr.bf16.mxu0 %v665_v0  ;;  %477 = vmatprep.mubr.msk.f32.mxu0 %vm666_vm0, %v667_v1  ;;  %v514_v39 = vpack.c.bf16 %v256_v38, %v255_v37  ;;  %v517_v42 = vpack.c.bf16 %v258_v41, %v257_v40  ;;  %v259_v43 = vld [vmem:[#allocation8 + $0x40] sm:$0xff]  ;;  %v260_v44 = vld [vmem:[#allocation8 + $0x48] sm:$0xff]  ;;  %v261_v46 = vld [vmem:[#allocation8 + $0x50] sm:$0xff] }
  0x54   :  { %509 = vmatpush3.bf16.msra.mxu0 %v508_v34  ;;  %v520_v45 = vpack.c.bf16 %v260_v44, %v259_v43  ;;  %v262_v47 = vld [vmem:[#allocation8 + $0x58] sm:$0xff]  ;;  %v263_v49 = vld [vmem:[#allocation8 + $0x60] sm:$0xff]  ;;  %v264_v50 = vld [vmem:[#allocation8 + $0x68] sm:$0xff] }
  0x55   :  { %491 = vmatpush3.bf16.msra.mxu1 %v490_v15  ;;  %510 = vmatprep.subr.bf16.mxu0 %v665_v0  ;;  %v523_v48 = vpack.c.bf16 %v262_v47, %v261_v46  ;;  %v526_v51 = vpack.c.bf16 %v264_v50, %v263_v49  ;;  %v359_v52 = vld [vmem:[%s801_s4] ss:$0 sm:$0xff]  ;;  %v265_v57 = vld [vmem:[#allocation8 + $0x70] sm:$0xff]  ;;  %v266_v58 = vld [vmem:[#allocation8 + $0x78] sm:$0xff] }
  0x56   :  { %492 = vmatprep.subr.bf16.mxu1 %v665_v0  ;;  %v529_v59 = vpack.c.bf16 %v266_v58, %v265_v57  ;;  %v361_v60 = vld [vmem:[%s801_s4 + $0x1] ss:$0 sm:$0xff]  ;;  %v362_v1 = vld [vmem:[%s801_s4 + $0x2] ss:$0 sm:$0xff] }
  0x58   :  { %512 = vmatpush3.bf16.msra.mxu0 %v511_v36 }
  0x59   :  { %494 = vmatpush3.bf16.msra.mxu1 %v493_v18  ;;  %513 = vmatprep.subr.bf16.mxu0 %v665_v0 }
  0x5a   :  { %495 = vmatprep.subr.bf16.mxu1 %v665_v0 }
  0x5c   :  { %515 = vmatpush3.bf16.msra.mxu0 %v514_v39 }
  0x5d   :  { %497 = vmatpush3.bf16.msra.mxu1 %v496_v21  ;;  %516 = vmatprep.subr.bf16.mxu0 %v665_v0 }
  0x5e   :  { %498 = vmatprep.subr.bf16.mxu1 %v665_v0 }
  0x60   :  { %518 = vmatpush3.bf16.msra.mxu0 %v517_v42 }
  0x61   :  { %500 = vmatpush3.bf16.msra.mxu1 %v499_v24  ;;  %519 = vmatprep.subr.bf16.mxu0 %v665_v0 }
  0x62   :  { %501 = vmatprep.subr.bf16.mxu1 %v665_v0 }
  0x64   :  { %521 = vmatpush3.bf16.msra.mxu0 %v520_v45 }
  0x65   :  { %503 = vmatpush3.bf16.msra.mxu1 %v502_v27  ;;  %522 = vmatprep.subr.bf16.mxu0 %v665_v0 }
  0x66   :  { %504 = vmatprep.subr.bf16.mxu1 %v665_v0 }
  0x68   :  { %524 = vmatpush3.bf16.msra.mxu0 %v523_v48 }
  0x69   :  { %506 = vmatpush3.bf16.msra.mxu1 %v505_v30  ;;  %525 = vmatprep.subr.bf16.mxu0 %v665_v0 }
  0x6c   :  { %527 = vmatpush3.bf16.msra.mxu0 %v526_v51 }
  0x6d   :  { %528 = vmatprep.subr.bf16.mxu0 %v665_v0 }
  0x70   :  { %530 = vmatpush3.bf16.msra.mxu0 %v529_v59 }
 0x125   :  { %v155_v53 = vpop.f32.mrb[0].mxu0 }
 0x126   :  { %v156_v54 = vadd.f32 %v359_v52, %v155_v53  ;;  %v409_v55 = vpop.f32.mrb[1].mxu0 }
 0x128   :  { %v159_v56 = vmax.f32 %v156_v54, 0.0 }
 0x12a   :  { %443 = vmatmul.mubr.f32.vlgmr.msra.gmra.mrb[0].mxu1 %v159_v56 }
 0x1fd   :  { %v246_v61 = vpop.f32.mrb[0].mxu1 }
 0x1fe   :  { %v247_v62 = vadd.f32 %v361_v60, %v246_v61  ;;  %v444_v63 = vpop.f32.mrb[1].mxu1 }
 0x200   :  { %v250_v0 = vmax.f32 %v247_v62, 0.0 }
 0x202   :  { %478 = vmatmul.mubr.f32.vlgmr.msra.gmra.mrb[2].mxu0 %v250_v0 }
 0x2d5   :  { %v337_v2 = vpop.f32.mrb[2].mxu0 }
 0x2d6   :  { %v338_v3 = vadd.f32 %v362_v1, %v337_v2  ;;  %v479_v4 = vpop.f32.mrb[3].mxu0 }
 0x2d8   :  { %341 = vst [vmem:[#allocation10] sm:$0xff] %v338_v3 }
 0x2d9   :  { %640 = shalt.err (!%p637_p8)
}
 0x2da   :  { %s641_s24 = scalar_lea.hbm %s802_s5, 128 }
 0x2db   :  { %p642_p9 = scmp.ne.s32.totalorder %s802_s5, %s641_s24  ;;  %p645_p10 = scmp.lt.u32.totalorder %s641_s24, %s802_s5 }
 0x2dd   :  { %p647_p11 = pnand %p645_p10, %p642_p9 }
 0x2df   :  { %650 = shalt.err (!%p647_p11)
}
 0x2e0   :  { %351 = dma.vmem_to_hbm [thread:$0]  %s349_s20, 128, %s802_s5, [#allocation4]  }
 0x2e1   :  { %657 = dma.done.wait [#allocation4], 128  }
 0x2e2   :  { %658 = vsyncadd [#allocation4], 4294967168 }
 0x2e3   :  { %355 = vsyncpa [#allocation3], 1 }
 0x2e4   :  { %356 = vsyncpa [#allocation6], 1 }
 0x2e5   :  { %357 = vsyncpa [#allocation9], 1 }
 0x2e6   :  { %358 = vsyncpa [#allocation4], 1 }

</bundles_post_ra>
